<compile_context>
chip_gen: v7x
topology: tpu7x:2x2x1
jax: 0.10.0
libtpu: 0.0.40
codegen_flags: <defaults>
</compile_context>

<pallas_src>
from typing import NamedTuple

import jax
import jax.numpy as jnp
from jax import lax
from jax.experimental import pallas as pl
from jax.experimental.pallas import tpu as pltpu


def _round_up(n: int, m: int) -> int:
    return (n + m - 1) // m * m


class RitzParams(NamedTuple):
    H: int              # logical hidden size
    Hp: int             # lane-dense padded hidden size (multiple of 128)
    w1: jax.Array       # (Hp, Hp), matmul dtype, zero-padded
    b1: jax.Array       # (1, Hp), f32, zero-padded
    w2: jax.Array       # (Hp, Hp), matmul dtype, zero-padded
    b2: jax.Array       # (1, Hp), f32, zero-padded


def prepare_ritz_params(w1, b1, w2, b2, *, matmul_dtype=jnp.float32):
    """Pad to lane-dense Hp and cast ONCE (hoisted out of the per-call path)."""
    H = w1.shape[0]
    assert w1.shape == (H, H) and w2.shape == (H, H)
    assert b1.shape == (1, H) and b2.shape == (1, H)
    Hp = _round_up(max(H, 128), 128)
    pw = ((0, Hp - H), (0, Hp - H))
    pb = ((0, 0), (0, Hp - H))
    return RitzParams(
        H=H, Hp=Hp,
        w1=jnp.pad(w1, pw).astype(matmul_dtype),
        b1=jnp.pad(b1, pb).astype(jnp.float32),
        w2=jnp.pad(w2, pw).astype(matmul_dtype),
        b2=jnp.pad(b2, pb).astype(jnp.float32),
    )


def _make_ritz_kernel(num_steps: int):
    """Kernel: apply the RitzBlock `num_steps` times to one (TB, Hp) row tile."""

    def kernel(x_ref, w1_ref, b1_ref, w2_ref, b2_ref, o_ref):
        # f32 carry for the residual stream regardless of the HBM io dtype.
        x0 = x_ref[...].astype(jnp.float32)          # (TB, Hp)
        w1 = w1_ref[...]                             # (Hp, Hp) resident
        w2 = w2_ref[...]
        b1 = b1_ref[...]                             # (1, Hp) f32
        b2 = b2_ref[...]

        def one_step(xc):
            # layer1: MXU matmul (f32 acc), bias on VPU, tanh on EUP.
            h1 = jnp.tanh(
                jnp.dot(xc.astype(w1.dtype), w1,
                        preferred_element_type=jnp.float32) + b1)
            # layer2
            h2 = jnp.tanh(
                jnp.dot(h1.astype(w2.dtype), w2,
                        preferred_element_type=jnp.float32) + b2)
            return h2 + xc                           # residual

        if num_steps == 1:
            xn = one_step(x0)
        else:
            xn = lax.fori_loop(0, num_steps, lambda _, c: one_step(c), x0,
                               unroll=num_steps <= 8)
        o_ref[...] = xn.astype(o_ref.dtype)

    return kernel


def ritz_block(x, params: RitzParams, *, num_steps: int = 1,
               block_rows: int = 1024, target_row_blocks: int = 2):
    """Apply RitzBlock `num_steps` times: X <- tanh(tanh(X@W1+b1)@W2+b2) + X.

    `params` must come from prepare_ritz_params (padding/casts hoisted).
    Activations stream at x.dtype; all accumulation is f32 inside the kernel.
    """
    H, Hp = params.H, params.Hp
    B = x.shape[0]
    assert x.ndim == 2 and x.shape[1] == H
    assert num_steps >= 1 and target_row_blocks >= 1

    # Row tile: multiple of 8 (sublane constraint), aiming for >= 2 grid steps
    # so dimension_semantics=("parallel",) can use both TCs on v7x.
    block_rows = max(8, (block_rows // 8) * 8)
    TB = min(block_rows, _round_up(max(pl.cdiv(B, target_row_blocks), 8), 8))
    grid = (pl.cdiv(B, TB),)          # no row padding: last block is partial

    io_dtype = x.dtype
    # Zero column pad H -> Hp only (keeps the matmul K-reduction exact).
    xp = jnp.pad(x, ((0, 0), (0, Hp - H)))                   # (B, Hp)

    row_spec = pl.BlockSpec((TB, Hp), lambda i: (i, 0))      # pipelined tiles
    w_spec = pl.BlockSpec((Hp, Hp), lambda i: (0, 0))        # resident in VMEM
    b_spec = pl.BlockSpec((1, Hp), lambda i: (0, 0))         # resident in VMEM

    w_itemsize = params.w1.dtype.itemsize
    io_itemsize = jnp.dtype(io_dtype).itemsize
    cost = pl.CostEstimate(
        flops=4 * num_steps * B * Hp * Hp,          # 2 matmuls / step
        transcendentals=2 * num_steps * B * Hp,     # 2 tanh / step / element
        bytes_accessed=(2 * B * Hp * io_itemsize    # stream x in, out once
                        + 2 * Hp * Hp * w_itemsize  # weights once
                        + 2 * Hp * 4),              # biases once
    )

    # Scoped-VMEM estimate: in/out tiles double-buffered + resident params
    # + in-kernel f32 temporaries.  Only override the limit when needed.
    est_vmem = (4 * TB * Hp * io_itemsize
                + 4 * Hp * Hp * w_itemsize
                + 3 * TB * Hp * 4
                + 4 * Hp * 4)
    cp_kwargs = dict(dimension_semantics=("parallel",))
    if est_vmem > 12 * 1024 * 1024:
        cp_kwargs["vmem_limit_bytes"] = min(int(est_vmem * 1.5), 64 * 1024 * 1024)

    out_p = pl.pallas_call(
        _make_ritz_kernel(num_steps),
        out_shape=jax.ShapeDtypeStruct((B, Hp), io_dtype),
        grid=grid,
        in_specs=[row_spec, w_spec, b_spec, w_spec, b_spec],
        out_specs=row_spec,
        compiler_params=pltpu.CompilerParams(**cp_kwargs),
        cost_estimate=cost,
    )(xp, params.w1, params.b1, params.w2, params.b2)

    return out_p[:, :H]


def ritz_block_ref(x, w1, b1, w2, b2):
    h1 = jnp.tanh(x @ w1 + b1)
    h2 = jnp.tanh(h1 @ w2 + b2)
    return h2 + x


def ritz_block_ref_n(x, w1, b1, w2, b2, n):
    for _ in range(n):
        x = ritz_block_ref(x, w1, b1, w2, b2)
    return x


if __name__ == "__main__":
    def make_inputs(batch, n_hid, key):
        kx, k1, k2, k3, k4 = jax.random.split(key, 5)
        # Module __init__ uses zeros (forward would trivially return X);
        # use small deterministic random values so the kernel is exercised.
        x = jax.random.normal(kx, (batch, n_hid), dtype=jnp.float32)
        w1 = 0.1 * jax.random.normal(k1, (n_hid, n_hid), dtype=jnp.float32)
        b1 = 0.1 * jax.random.normal(k2, (1, n_hid), dtype=jnp.float32)
        w2 = 0.1 * jax.random.normal(k3, (n_hid, n_hid), dtype=jnp.float32)
        b2 = 0.1 * jax.random.normal(k4, (1, n_hid), dtype=jnp.float32)
        return x, w1, b1, w2, b2

    # --- small demo shape (batch=8, hidden=32), f32: exact single step ------
    x, w1, b1, w2, b2 = make_inputs(8, 32, jax.random.PRNGKey(0))
    params32 = prepare_ritz_params(w1, b1, w2, b2)            # hoisted once
    out = ritz_block(x, params32)
    jax.block_until_ready(out)
    ref = ritz_block_ref(x, w1, b1, w2, b2)
    assert out.shape == (8, 32)
    assert jnp.allclose(out, ref, atol=1e-5, rtol=1e-5), "f32 mismatch"

    # --- fused 4-step integrator loop in ONE pallas_call (small shape) ------
    out4 = ritz_block(x, params32, num_steps=4)
    jax.block_until_ready(out4)
    ref4 = ritz_block_ref_n(x, w1, b1, w2, b2, 4)
    assert jnp.allclose(out4, ref4, atol=5e-4, rtol=5e-4), "fused f32 mismatch"

    # --- module-sized hidden (n_hid=200 -> Hp=256), B=300: 2 row blocks with
    #     a partial last block (no row padding), params hoisted + reused -----
    x2, w12, b12, w22, b22 = make_inputs(300, 200, jax.random.PRNGKey(0))
    params200 = prepare_ritz_params(w12, b12, w22, b22)
    ref2 = ritz_block_ref(x2, w12, b12, w22, b22)

    out2 = ritz_block(x2, params200)
    jax.block_until_ready(out2)
    assert out2.shape == (300, 200)
    assert jnp.allclose(out2, ref2, atol=1e-4, rtol=1e-4), "grid f32 mismatch"

    out2_4 = ritz_block(x2, params200, num_steps=4)
    jax.block_until_ready(out2_4)
    ref2_4 = ritz_block_ref_n(x2, w12, b12, w22, b22, 4)
    assert jnp.allclose(out2_4, ref2_4, atol=5e-4, rtol=5e-4), \
        "fused grid f32 mismatch"

    # --- opt-in bf16: bf16 activation streaming + bf16 MXU operands ---------
    params200_bf16 = prepare_ritz_params(w12, b12, w22, b22,
                                         matmul_dtype=jnp.bfloat16)
    out2_bf = ritz_block(x2.astype(jnp.bfloat16), params200_bf16)
    jax.block_until_ready(out2_bf)
    assert out2_bf.dtype == jnp.bfloat16
    assert jnp.allclose(out2_bf.astype(jnp.float32), ref2,
                        atol=1e-1, rtol=1e-1), "bf16 mismatch"

    print("KERNEL_OK")
</pallas_src>

<mosaic_0001>
module attributes {stable_mosaic.version = 11 : i64} {
  func.func @kernel(%arg0: i32, %arg1: memref<8x128xf32, #tpu.memory_space<vmem>>, %arg2: memref<128x128xf32, #tpu.memory_space<vmem>>, %arg3: memref<1x128xf32, #tpu.memory_space<vmem>>, %arg4: memref<128x128xf32, #tpu.memory_space<vmem>>, %arg5: memref<1x128xf32, #tpu.memory_space<vmem>>, %arg6: memref<8x128xf32, #tpu.memory_space<vmem>>) attributes {dimension_semantics = [#tpu.dimension_semantics<parallel>], iteration_bounds = array<i64: 1>, scalar_prefetch = 0 : i64, scratch_operands = 0 : i64, tpu.core_type = #tpu.core_type<tc>, window_params = [{transform_indices = @transform_0, window_bounds = array<i64: 8, 128>}, {pipeline_mode = #tpu.pipeline_mode<synchronous>, transform_indices = @transform_1, window_bounds = array<i64: 128, 128>}, {pipeline_mode = #tpu.pipeline_mode<synchronous>, transform_indices = @transform_2, window_bounds = array<i64: 1, 128>}, {pipeline_mode = #tpu.pipeline_mode<synchronous>, transform_indices = @transform_3, window_bounds = array<i64: 128, 128>}, {pipeline_mode = #tpu.pipeline_mode<synchronous>, transform_indices = @transform_4, window_bounds = array<i64: 1, 128>}, {transform_indices = @transform_5, window_bounds = array<i64: 8, 128>}]} {
    %c0 = arith.constant 0 : index
    %c0_0 = arith.constant 0 : index
    %0 = vector.load %arg1[%c0, %c0_0] : memref<8x128xf32, #tpu.memory_space<vmem>>, vector<8x128xf32>
    %c0_1 = arith.constant 0 : index
    %c0_2 = arith.constant 0 : index
    %1 = vector.load %arg2[%c0_1, %c0_2] : memref<128x128xf32, #tpu.memory_space<vmem>>, vector<128x128xf32>
    %c0_3 = arith.constant 0 : index
    %c0_4 = arith.constant 0 : index
    %2 = vector.load %arg4[%c0_3, %c0_4] : memref<128x128xf32, #tpu.memory_space<vmem>>, vector<128x128xf32>
    %c0_5 = arith.constant 0 : index
    %c0_6 = arith.constant 0 : index
    %3 = vector.load %arg3[%c0_5, %c0_6] : memref<1x128xf32, #tpu.memory_space<vmem>>, vector<1x128xf32>
    %c0_7 = arith.constant 0 : index
    %c0_8 = arith.constant 0 : index
    %4 = vector.load %arg5[%c0_7, %c0_8] : memref<1x128xf32, #tpu.memory_space<vmem>>, vector<1x128xf32>
    %cst = arith.constant dense<0.000000e+00> : vector<8x128xf32>
    %5 = tpu.matmul %0, %1, %cst {dimension_numbers = #tpu.dot_dimension_numbers<[1], [0], [0], [1], [0, 0, 1, 1], [], []>} : vector<8x128xf32>, vector<128x128xf32>, vector<8x128xf32> -> vector<8x128xf32>
    %6 = vector.broadcast %3 : vector<1x128xf32> to vector<8x128xf32>
    %7 = arith.addf %5, %6 : vector<8x128xf32>
    %8 = math.tanh %7 : vector<8x128xf32>
    %cst_9 = arith.constant dense<0.000000e+00> : vector<8x128xf32>
    %9 = tpu.matmul %8, %2, %cst_9 {dimension_numbers = #tpu.dot_dimension_numbers<[1], [0], [0], [1], [0, 0, 1, 1], [], []>} : vector<8x128xf32>, vector<128x128xf32>, vector<8x128xf32> -> vector<8x128xf32>
    %10 = vector.broadcast %4 : vector<1x128xf32> to vector<8x128xf32>
    %11 = arith.addf %9, %10 : vector<8x128xf32>
    %12 = math.tanh %11 : vector<8x128xf32>
    %13 = arith.addf %12, %0 : vector<8x128xf32>
    %c0_10 = arith.constant 0 : index
    %c0_11 = arith.constant 0 : index
    %14 = vector.load %arg6[%c0_10, %c0_11] : memref<8x128xf32, #tpu.memory_space<vmem>>, vector<8x128xf32>
    tpu.vector_store %arg6[%c0_10, %c0_11], %13 {strides = array<i32>} : memref<8x128xf32, #tpu.memory_space<vmem>>, vector<8x128xf32>,
    return
  }
  func.func @transform_0(%arg0: i32) -> (i32, i32) {
    %c0_i32 = arith.constant 0 : i32
    %c0_i32_0 = arith.constant 0 : i32
    return %arg0, %c0_i32 : i32, i32
  }
  func.func @transform_1(%arg0: i32) -> (i32, i32) {
    %c0_i32 = arith.constant 0 : i32
    %c0_i32_0 = arith.constant 0 : i32
    %c0_i32_1 = arith.constant 0 : i32
    return %c0_i32, %c0_i32_0 : i32, i32
  }
  func.func @transform_2(%arg0: i32) -> (i32, i32) {
    %c0_i32 = arith.constant 0 : i32
    %c0_i32_0 = arith.constant 0 : i32
    %c0_i32_1 = arith.constant 0 : i32
    return %c0_i32, %c0_i32_0 : i32, i32
  }
  func.func @transform_3(%arg0: i32) -> (i32, i32) {
    %c0_i32 = arith.constant 0 : i32
    %c0_i32_0 = arith.constant 0 : i32
    %c0_i32_1 = arith.constant 0 : i32
    return %c0_i32, %c0_i32_0 : i32, i32
  }
  func.func @transform_4(%arg0: i32) -> (i32, i32) {
    %c0_i32 = arith.constant 0 : i32
    %c0_i32_0 = arith.constant 0 : i32
    %c0_i32_1 = arith.constant 0 : i32
    return %c0_i32, %c0_i32_0 : i32, i32
  }
  func.func @transform_5(%arg0: i32) -> (i32, i32) {
    %c0_i32 = arith.constant 0 : i32
    %c0_i32_0 = arith.constant 0 : i32
    return %arg0, %c0_i32 : i32, i32
  }
}

</mosaic_0001>

<bundles_post_ra>
// kernel: tpu_custom_call.1
= control target key start
LH: loop header
LB: loop body
LE: loop exit
PB: predicated region body
PF: predicated region fallthrough
CT: control target
= control target key end

     0   :  { %10 = vsyncpa [#allocation3], 0  ;;  %s643_s0 = inlined_call_operand.hbm [shape: f32[8,128], index: 0, kind: input, shape index: {}]   ;;  %s644_s1 = inlined_call_operand.hbm [shape: f32[128,128], index: 1, kind: input, shape index: {}]   ;;  %s645_s2 = inlined_call_operand.vmem [shape: f32[1,128], index: 2, kind: input, shape index: {}]   ;;  %s646_s3 = inlined_call_operand.hbm [shape: f32[128,128], index: 3, kind: input, shape index: {}]   ;;  %s647_s4 = inlined_call_operand.vmem [shape: f32[1,128], index: 4, kind: input, shape index: {}]   ;;  %s648_s5 = inlined_call_operand.hbm [shape: f32[8,128], index: 5, kind: output, shape index: {}]  }
   0x1   :  { %11 = vsyncpa [#allocation6], 0 }
   0x2   :  { %12 = vsyncpa [#allocation4], 0  ;;  %s528_s18 = smov [#allocation5]   ;;  %s434_s22 = scalar_lea.hbm %s644_s1, 2048 }
   0x3   :  { %s28_s19 = sshll.u32 %s528_s18, 4  ;;  %p435_p0 = scmp.ne.s32.totalorder %s644_s1, %s434_s22  ;;  %s29_s19 = int_to_ptr.vmem [resolvable:$true] %s28_s19 }
   0x4   :  { %p438_p1 = scmp.lt.u32.totalorder %s434_s22, %s644_s1 }
   0x6   :  { %p440_p2 = pnand %p438_p1, %p435_p0 }
   0x8   :  { %443 = shalt.err (!%p440_p2)
}
   0x9   :  { %s444_s27 = scalar_lea.vmem %s29_s19, 2048  ;;  %p449_p4 = scmp.lt.s32.totalorder %s29_s19, %s29_s19 }
   0xa   :  { %p445_p3 = scmp.ne.s32.totalorder %s29_s19, %s444_s27  ;;  %p450_p5 = scmp.lt.s32.totalorder %s444_s27, %s444_s27 }
   0xc   :  { %p451_p6 = por %p450_p5, %p449_p4 }
   0xe   :  { %p452_p7 = pnand %p451_p6, %p445_p3 }
  0x10   :  { %455 = shalt.err (!%p452_p7)
}
  0x11   :  { %s529_s28 = smov 128   ;;  %s530_s29 = smov 8  }
  0x12   :  { %34 = dma.hbm_to_vmem [thread:$0]  %s644_s1, 2048, %s29_s19, [#allocation6], %s529_s28, %s529_s28, %s530_s29  }
  0x13   :  { %s531_s7 = smov [#allocation2]   ;;  %s532_s9 = smov [#allocation7]  }
  0x14   :  { %s19_s8 = sshll.u32 %s531_s7, 4  ;;  %s42_s10 = sshll.u32 %s532_s9, 4  ;;  %s20_s8 = int_to_ptr.vmem [resolvable:$true] %s19_s8  ;;  %s43_s10 = int_to_ptr.vmem [resolvable:$true] %s42_s10 }
  0x15   :  { %s456_s13 = scalar_lea.hbm %s643_s0, 128 }
  0x16   :  { %p457_p8 = scmp.ne.s32.totalorder %s643_s0, %s456_s13  ;;  %p460_p9 = scmp.lt.u32.totalorder %s456_s13, %s643_s0 }
  0x18   :  { %p462_p10 = pnand %p460_p9, %p457_p8 }
  0x1a   :  { %465 = shalt.err (!%p462_p10)
}
  0x1b   :  { %s466_s1 = scalar_lea.vmem %s20_s8, 128  ;;  %p471_p12 = scmp.lt.s32.totalorder %s20_s8, %s20_s8 }
  0x1c   :  { %p467_p11 = scmp.ne.s32.totalorder %s20_s8, %s466_s1  ;;  %p472_p13 = scmp.lt.s32.totalorder %s466_s1, %s466_s1 }
  0x1e   :  { %p473_p0 = por %p472_p13, %p471_p12 }
  0x20   :  { %p474_p1 = pnand %p473_p0, %p467_p11 }
  0x22   :  { %477 = shalt.err (!%p474_p1)
}
  0x23   :  { %22 = dma.hbm_to_vmem [thread:$0]  %s643_s0, 128, %s20_s8, [#allocation3]  }
  0x24   :  { %s478_s22 = scalar_lea.hbm %s646_s3, 2048 }
  0x25   :  { %p479_p2 = scmp.ne.s32.totalorder %s646_s3, %s478_s22  ;;  %p482_p3 = scmp.lt.u32.totalorder %s478_s22, %s646_s3 }
  0x27   :  { %p484_p4 = pnand %p482_p3, %p479_p2 }
  0x29   :  { %487 = shalt.err (!%p484_p4)
}
  0x2a   :  { %s488_s27 = scalar_lea.vmem %s43_s10, 2048  ;;  %p493_p6 = scmp.lt.s32.totalorder %s43_s10, %s43_s10 }
  0x2b   :  { %p489_p5 = scmp.ne.s32.totalorder %s43_s10, %s488_s27  ;;  %p494_p7 = scmp.lt.s32.totalorder %s488_s27, %s488_s27 }
  0x2d   :  { %p495_p8 = por %p494_p7, %p493_p6 }
  0x2f   :  { %p496_p9 = pnand %p495_p8, %p489_p5 }
  0x31   :  { %499 = shalt.err (!%p496_p9)
}
  0x32   :  { %48 = dma.hbm_to_vmem [thread:$0]  %s646_s3, 2048, %s43_s10, [#allocation6], %s529_s28, %s529_s28, %s530_s29  }
  0x33   :  { %522 = dma.done.wait [#allocation3], 128  }
  0x34   :  { %523 = vsyncadd [#allocation3], 4294967168 }
  0x35   :  { %524 = dma.done.wait [#allocation6], 4096  }
  0x36   :  { %525 = vsyncadd [#allocation6], 4294963200  ;;  %v533_v0 = vmov 0.0|0.0   ;;  %vm534_vm0 = vmmov 0   ;;  %v535_v1 = vmov 0.0   ;;  %v61_v2 = vld [vmem:[#allocation5] sm:$0xff] }
  0x37   :  { %373 = vmatprep.subr.bf16.mxu0 %v533_v0  ;;  %335 = vmatprep.mubr.msk.f32.mxu0 %vm534_vm0, %v535_v1  ;;  %v62_v3 = vld [vmem:[#allocation5 + $0x8] sm:$0xff]  ;;  %v63_v4 = vld [vmem:[#allocation5 + $0x10] sm:$0xff]  ;;  %v64_v6 = vld [vmem:[#allocation5 + $0x18] sm:$0xff]  ;;  %s536_s7 = smov [#allocation8]  }
  0x38   :  { %397 = vmatprep.subr.bf16.mxu1 %v533_v0  ;;  %370 = vmatprep.mubr.msk.f32.mxu1 %vm534_vm0, %v535_v1  ;;  %v374_v5 = vpack.c.bf16 %v62_v3, %v61_v2  ;;  %v377_v7 = vpack.c.bf16 %v64_v6, %v63_v4  ;;  %v65_v8 = vld [vmem:[#allocation5 + $0x20] sm:$0xff]  ;;  %v66_v9 = vld [vmem:[#allocation5 + $0x28] sm:$0xff]  ;;  %v79_v12 = vld [vmem:[#allocation7 + $0x10] sm:$0xff]  ;;  %s257_s8 = sshll.u32 %s536_s7, 4  ;;  %s258_s8 = int_to_ptr.vmem [resolvable:$true] %s257_s8 }
  0x39   :  { %v77_v10 = vld [vmem:[#allocation7] sm:$0xff]  ;;  %v78_v11 = vld [vmem:[#allocation7 + $0x8] sm:$0xff]  ;;  %v80_v13 = vld [vmem:[#allocation7 + $0x18] sm:$0xff]  ;;  %v380_v14 = vpack.c.bf16 %v66_v9, %v65_v8  ;;  %p505_p11 = scmp.lt.s32.totalorder %s258_s8, %s258_s8 }
  0x3a   :  { %375 = vmatpush3.bf16.msra.mxu0 %v374_v5  ;;  %v398_v15 = vpack.c.bf16 %v78_v11, %v77_v10  ;;  %v67_v16 = vld [vmem:[#allocation5 + $0x30] sm:$0xff]  ;;  %v68_v17 = vld [vmem:[#allocation5 + $0x38] sm:$0xff]  ;;  %v401_v18 = vpack.c.bf16 %v80_v13, %v79_v12  ;;  %v81_v19 = vld [vmem:[#allocation7 + $0x20] sm:$0xff] }
  0x3b   :  { %376 = vmatprep.subr.bf16.mxu0 %v533_v0  ;;  %v82_v20 = vld [vmem:[#allocation7 + $0x28] sm:$0xff]  ;;  %v383_v21 = vpack.c.bf16 %v68_v17, %v67_v16  ;;  %v69_v22 = vld [vmem:[#allocation5 + $0x40] sm:$0xff]  ;;  %v83_v25 = vld [vmem:[#allocation7 + $0x30] sm:$0xff] }
  0x3c   :  { %399 = vmatpush3.bf16.msra.mxu1 %v398_v15  ;;  %v70_v23 = vld [vmem:[#allocation5 + $0x48] sm:$0xff]  ;;  %v404_v24 = vpack.c.bf16 %v82_v20, %v81_v19  ;;  %v84_v26 = vld [vmem:[#allocation7 + $0x38] sm:$0xff]  ;;  %v71_v28 = vld [vmem:[#allocation5 + $0x50] sm:$0xff] }
  0x3d   :  { %400 = vmatprep.subr.bf16.mxu1 %v533_v0  ;;  %v386_v27 = vpack.c.bf16 %v70_v23, %v69_v22  ;;  %v72_v29 = vld [vmem:[#allocation5 + $0x58] sm:$0xff]  ;;  %v407_v30 = vpack.c.bf16 %v84_v26, %v83_v25  ;;  %v85_v31 = vld [vmem:[#allocation7 + $0x40] sm:$0xff]  ;;  %v86_v32 = vld [vmem:[#allocation7 + $0x48] sm:$0xff] }
  0x3e   :  { %378 = vmatpush3.bf16.msra.mxu0 %v377_v7  ;;  %v389_v33 = vpack.c.bf16 %v72_v29, %v71_v28  ;;  %v73_v34 = vld [vmem:[#allocation5 + $0x60] sm:$0xff]  ;;  %v74_v35 = vld [vmem:[#allocation5 + $0x68] sm:$0xff]  ;;  %v410_v36 = vpack.c.bf16 %v86_v32, %v85_v31  ;;  %v75_v38 = vld [vmem:[#allocation5 + $0x70] sm:$0xff] }
  0x3f   :  { %379 = vmatprep.subr.bf16.mxu0 %v533_v0  ;;  %v392_v37 = vpack.c.bf16 %v74_v35, %v73_v34  ;;  %v76_v39 = vld [vmem:[#allocation5 + $0x78] sm:$0xff]  ;;  %v87_v42 = vld [vmem:[#allocation7 + $0x50] sm:$0xff]  ;;  %v89_v45 = vld [vmem:[#allocation7 + $0x60] sm:$0xff] }
  0x40   :  { %402 = vmatpush3.bf16.msra.mxu1 %v401_v18  ;;  %v395_v40 = vpack.c.bf16 %v76_v39, %v75_v38  ;;  %v60_v41 = vld [vmem:[#allocation2] sm:$0xff]  ;;  %v90_v46 = vld [vmem:[#allocation7 + $0x68] sm:$0xff]  ;;  %v91_v48 = vld [vmem:[#allocation7 + $0x70] sm:$0xff] }
  0x41   :  { %403 = vmatprep.subr.bf16.mxu1 %v533_v0  ;;  %v88_v43 = vld [vmem:[#allocation7 + $0x58] sm:$0xff]  ;;  %v416_v47 = vpack.c.bf16 %v90_v46, %v89_v45 }
  0x42   :  { %381 = vmatpush3.bf16.msra.mxu0 %v380_v14  ;;  %v413_v44 = vpack.c.bf16 %v88_v43, %v87_v42  ;;  %v92_v49 = vld [vmem:[#allocation7 + $0x78] sm:$0xff] }
  0x43   :  { %382 = vmatprep.subr.bf16.mxu0 %v533_v0  ;;  %v419_v50 = vpack.c.bf16 %v92_v49, %v91_v48  ;;  %v267_v51 = vld [vmem:[%s645_s2] ss:$0 sm:$0xff]  ;;  %s500_s2 = scalar_lea.vmem %s258_s8, 128 }
  0x44   :  { %405 = vmatpush3.bf16.msra.mxu1 %v404_v24  ;;  %v268_v56 = vld [vmem:[%s647_s4] ss:$0 sm:$0xff]  ;;  %p501_p10 = scmp.ne.s32.totalorder %s258_s8, %s500_s2  ;;  %p506_p12 = scmp.lt.s32.totalorder %s500_s2, %s500_s2 }
  0x45   :  { %406 = vmatprep.subr.bf16.mxu1 %v533_v0 }
  0x46   :  { %384 = vmatpush3.bf16.msra.mxu0 %v383_v21  ;;  %p507_p13 = por %p506_p12, %p505_p11 }
  0x47   :  { %385 = vmatprep.subr.bf16.mxu0 %v533_v0 }
  0x48   :  { %408 = vmatpush3.bf16.msra.mxu1 %v407_v30  ;;  %p508_p0 = pnand %p507_p13, %p501_p10 }
  0x49   :  { %409 = vmatprep.subr.bf16.mxu1 %v533_v0 }
  0x4a   :  { %387 = vmatpush3.bf16.msra.mxu0 %v386_v27 }
  0x4b   :  { %388 = vmatprep.subr.bf16.mxu0 %v533_v0 }
  0x4c   :  { %411 = vmatpush3.bf16.msra.mxu1 %v410_v36 }
  0x4d   :  { %412 = vmatprep.subr.bf16.mxu1 %v533_v0 }
  0x4e   :  { %390 = vmatpush3.bf16.msra.mxu0 %v389_v33 }
  0x4f   :  { %391 = vmatprep.subr.bf16.mxu0 %v533_v0 }
  0x50   :  { %414 = vmatpush3.bf16.msra.mxu1 %v413_v44 }
  0x51   :  { %415 = vmatprep.subr.bf16.mxu1 %v533_v0 }
  0x52   :  { %393 = vmatpush3.bf16.msra.mxu0 %v392_v37 }
  0x53   :  { %394 = vmatprep.subr.bf16.mxu0 %v533_v0 }
  0x54   :  { %417 = vmatpush3.bf16.msra.mxu1 %v416_v47 }
  0x55   :  { %418 = vmatprep.subr.bf16.mxu1 %v533_v0 }
  0x56   :  { %396 = vmatpush3.bf16.msra.mxu0 %v395_v40 }
  0x58   :  { %420 = vmatpush3.bf16.msra.mxu1 %v419_v50 }
  0x59   :  { %336 = vmatmul.mubr.f32.vlgmr.msra.gmra.mrb[0].mxu0 %v60_v41 }
 0x12c   :  { %v167_v52 = vpop.f32.mrb[0].mxu0 }
 0x12d   :  { %v168_v53 = vadd.f32 %v267_v51, %v167_v52  ;;  %v337_v54 = vpop.f32.mrb[1].mxu0 }
 0x12f   :  { %430 = vtanh.f32 %v168_v53 }
 0x139   :  { %v431_v55 = vpop.eup %430 }
 0x13a   :  { %371 = vmatmul.mubr.f32.vlgmr.msra.gmra.mrb[0].mxu1 %v431_v55 }
 0x20d   :  { %v244_v57 = vpop.f32.mrb[0].mxu1 }
 0x20e   :  { %v245_v58 = vadd.f32 %v268_v56, %v244_v57  ;;  %v372_v59 = vpop.f32.mrb[1].mxu1 }
 0x210   :  { %432 = vtanh.f32 %v245_v58 }
 0x21a   :  { %v433_v60 = vpop.eup %432 }
 0x21b   :  { %v249_v61 = vadd.f32 %v433_v60, %v60_v41 }
 0x21d   :  { %250 = vst [vmem:[#allocation8] sm:$0xff] %v249_v61 }
 0x21e   :  { %511 = shalt.err (!%p508_p0)
}
 0x21f   :  { %s512_s4 = scalar_lea.hbm %s648_s5, 128 }
 0x220   :  { %p513_p1 = scmp.ne.s32.totalorder %s648_s5, %s512_s4  ;;  %p516_p2 = scmp.lt.u32.totalorder %s512_s4, %s648_s5 }
 0x222   :  { %p518_p3 = pnand %p516_p2, %p513_p1 }
 0x224   :  { %521 = shalt.err (!%p518_p3)
}
 0x225   :  { %260 = dma.vmem_to_hbm [thread:$0]  %s258_s8, 128, %s648_s5, [#allocation4]  }
 0x226   :  { %526 = dma.done.wait [#allocation4], 128  }
 0x227   :  { %527 = vsyncadd [#allocation4], 4294967168 }
 0x228   :  { %264 = vsyncpa [#allocation3], 1 }
 0x229   :  { %265 = vsyncpa [#allocation6], 1 }
 0x22a   :  { %266 = vsyncpa [#allocation4], 1 }

</bundles_post_ra>
